<compile_context>
chip_gen: v5e
topology: v5e:2x2
jax: 0.10.0
libtpu: 0.0.40
codegen_flags: <defaults>
</compile_context>

<pallas_src>
import functools

import jax
import jax.numpy as jnp
from jax.experimental import pallas as pl
from jax.experimental.pallas import tpu as pltpu

NEG_SLOPE = 0.2
_VMEM_LIMIT_BYTES = 32 * 1024 * 1024   # > peak use; <= physical on v5e/v6e/v7x


# -----------------------------------------------------------------------------
# pltpu.roll sign-convention probe (run once, outside jit).
# -----------------------------------------------------------------------------
@functools.lru_cache(maxsize=None)
def _roll_matches_jnp() -> bool:
    """True iff pltpu.roll(x, s, axis) == jnp.roll(x, s, axis)."""
    def k(x_ref, o_ref):
        o_ref[...] = pltpu.roll(x_ref[...], shift=1, axis=1)

    x = jnp.tile(jnp.arange(128, dtype=jnp.float32)[None, :], (8, 1))
    out = pl.pallas_call(
        k, out_shape=jax.ShapeDtypeStruct((8, 128), jnp.float32))(x)
    return bool(out[0, 0] == 127.0)


def _roll_sign() -> int:
    return -1 if _roll_matches_jnp() else 1


# -----------------------------------------------------------------------------
# In-kernel helpers.
# -----------------------------------------------------------------------------
def _lrelu(y):
    return jnp.where(y >= 0.0, y, NEG_SLOPE * y)


def _spatial_index(L, W):
    """(1, L) int32 row / column index of each flattened pixel."""
    pos = jax.lax.broadcasted_iota(jnp.int32, (1, L), 1)
    if W & (W - 1) == 0:                       # power-of-two width: shift/and
        hh = pos >> (W.bit_length() - 1)
        ww = pos & (W - 1)
    else:
        hh = pos // W
        ww = pos - hh * W
    return hh, ww


def _im2col_cols(v, kh, kw, dil_h, dil_w, pad_h, pad_w,
                 hh, ww, H, W, roll_sign):
    """In-kernel im2col of a lane-flattened activation.

    v: (c, L) value, L == H*W row-major.  Returns (kh*kw*c, L) columns whose
    row order matches _wmat/_wmat_padded (tap-major, channel-minor), built with
    XLU lane rotations + boundary masks instead of XLA-materialized columns.
    """
    L = H * W
    pieces = []
    for i in range(kh):
        oh = i * dil_h - pad_h
        for j in range(kw):
            ow = j * dil_w - pad_w
            s = oh * W + ow
            if s % L == 0:
                sh = v
            else:
                sh = pltpu.roll(v, shift=(roll_sign * s) % L, axis=1)
            conds = []
            if oh > 0:
                conds.append(hh < H - oh)
            if oh < 0:
                conds.append(hh >= -oh)
            if ow > 0:
                conds.append(ww < W - ow)
            if ow < 0:
                conds.append(ww >= -ow)
            if conds:
                m = conds[0]
                for c in conds[1:]:
                    m = jnp.logical_and(m, c)
                sh = jnp.where(m, sh, 0.0)
            pieces.append(sh)
    if len(pieces) == 1:
        return pieces[0]
    return jnp.concatenate(pieces, axis=0)     # 8-aligned rows -> free concat


# -----------------------------------------------------------------------------
# Host-side weight packing.
# -----------------------------------------------------------------------------
def _wmat(p):
    kh, kw, cin, cout = p["w"].shape
    return p["w"].reshape(kh * kw * cin, cout)          # rows ordered (i, j, c)


def _wmat_padded(p, g):
    """(kh*kw*g, cout): each tap's cin channels zero-padded to g rows."""
    kh, kw, cin, cout = p["w"].shape
    w = jnp.zeros((kh, kw, g, cout), p["w"].dtype).at[:, :, :cin, :].set(p["w"])
    return w.reshape(kh * kw * g, cout)


def _pad_cout(m_t, b, g):
    """Pad a transposed weight (cout, K) and bias (cout,) to g output rows."""
    cout, k = m_t.shape
    mt = jnp.zeros((g, k), m_t.dtype).at[:cout, :].set(m_t)
    bb = jnp.zeros((g, 1), b.dtype).at[:cout, 0].set(b)
    return mt, bb


def _pack_rfb_weights(p, C, G):
    f32 = jnp.float32

    # head: the four 1x1 branch stems, one G-row output group per branch.
    heads, hbias = [], []
    for k in ("b1_1", "b2_1", "b3_1", "b4_1"):
        wt, bb = _pad_cout(_wmat(p[k]).T.astype(f32), p[k]["b"].astype(f32), G)
        heads.append(wt)
        hbias.append(bb)
    w_head_t = jnp.concatenate(heads, axis=0)            # (4G, C)
    b_head = jnp.concatenate(hbias, axis=0)               # (4G, 1)

    # mid: b2_2 (1x3), b3_2 (3x1), b4_2 (1x3) block-diagonal over G-padded cols.
    w_mid_t = jnp.zeros((3 * G, 9 * G), f32)
    b_mid = jnp.zeros((3 * G, 1), f32)
    for idx, k in enumerate(("b2_2", "b3_2", "b4_2")):
        wt, bb = _pad_cout(_wmat_padded(p[k], G).T.astype(f32),
                           p[k]["b"].astype(f32), G)
        w_mid_t = w_mid_t.at[idx * G:(idx + 1) * G,
                             idx * 3 * G:(idx + 1) * 3 * G].set(wt)
        b_mid = b_mid.at[idx * G:(idx + 1) * G].set(bb)

    # b4_3 (3x1).
    w_b43_t, b_b43 = _pad_cout(_wmat_padded(p["b4_3"], G).T.astype(f32),
                               p["b4_3"]["b"].astype(f32), G)       # (G, 3G)

    # tail: branch-final 3x3s with conv_linear folded in, + 0.2*shortcut.
    bc = C // 4
    w_lin = _wmat(p["conv_linear"]).astype(f32)           # (4*bc, C)
    b_tail = p["conv_linear"]["b"].astype(f32)
    rows = []
    for idx, k in enumerate(("b1_2", "b2_3", "b3_3", "b4_4")):
        wl = w_lin[idx * bc:(idx + 1) * bc]                # (bc, C)
        rows.append(_wmat_padded(p[k], G).astype(f32) @ wl)          # (9G, C)
        b_tail = b_tail + p[k]["b"].astype(f32) @ wl
    rows.append(0.2 * _wmat(p["shortcut"]).astype(f32))              # (C, C)
    b_tail = b_tail + 0.2 * p["shortcut"]["b"].astype(f32)
    w_tail_t = jnp.concatenate(rows, axis=0).T             # (C, 36G + C)
    return (w_head_t, b_head, w_mid_t, b_mid, w_b43_t, b_b43,
            w_tail_t, b_tail.reshape(C, 1))


# -----------------------------------------------------------------------------
# Pallas kernel 1: first 3x3 conv (C -> 4C), no activation.
# -----------------------------------------------------------------------------
def _make_conv3x3_kernel(H, W, roll_sign):
    L = H * W

    def kernel(x_ref, w_ref, b_ref, o_ref):
        x = x_ref[0].astype(jnp.float32)                   # (Cin, L)
        hh, ww = _spatial_index(L, W)
        cols = _im2col_cols(x, 3, 3, 1, 1, 1, 1, hh, ww, H, W, roll_sign)
        y = jnp.dot(w_ref[...], cols, preferred_element_type=jnp.float32)
        y = y + b_ref[...]                                 # no LeakyReLU here
        o_ref[0] = y.astype(o_ref.dtype)

    return kernel


def conv3x3_pallas(x_ncl, p, H, W, storage_dtype):
    N, cin, L = x_ncl.shape
    cout = p["w"].shape[-1]
    w_t = _wmat(p).T.astype(jnp.float32)                   # (cout, 9*cin)
    b = p["b"].reshape(cout, 1).astype(jnp.float32)
    return pl.pallas_call(
        _make_conv3x3_kernel(H, W, _roll_sign()),
        out_shape=jax.ShapeDtypeStruct((N, cout, L), storage_dtype),
        grid=(N,),
        in_specs=[
            pl.BlockSpec((1, cin, L), lambda n: (n, 0, 0)),
            pl.BlockSpec(w_t.shape, lambda n: (0, 0)),
            pl.BlockSpec(b.shape, lambda n: (0, 0)),
        ],
        out_specs=pl.BlockSpec((1, cout, L), lambda n: (n, 0, 0)),
        compiler_params=pltpu.CompilerParams(
            dimension_semantics=("parallel",),
            vmem_limit_bytes=_VMEM_LIMIT_BYTES),
    )(x_ncl.astype(storage_dtype), w_t, b)


# -----------------------------------------------------------------------------
# Pallas kernel 2/3: one fully fused ReceptiveFieldBlock + outer LeakyReLU.
# -----------------------------------------------------------------------------
def _make_rfb_kernel(C, G, H, W, roll_sign):
    L = H * W

    def kernel(x_ref, wh_ref, bh_ref, wm_ref, bm_ref, wb_ref, bb_ref,
               wt_ref, bt_ref, o_ref):
        x = x_ref[0].astype(jnp.float32)                   # (C, L)
        hh, ww = _spatial_index(L, W)
        cols = functools.partial(_im2col_cols, hh=hh, ww=ww, H=H, W=W,
                                 roll_sign=roll_sign)

        # four 1x1 branch stems + LeakyReLU in one dot.
        head = _lrelu(jnp.dot(wh_ref[...], x,
                              preferred_element_type=jnp.float32) + bh_ref[...])
        h1 = head[0:G]
        h2 = head[G:2 * G]
        h3 = head[2 * G:3 * G]
        h4 = head[3 * G:4 * G]

        # b2_2 (1x3) / b3_2 (3x1) / b4_2 (1x3) as one block-diagonal dot.
        cols_mid = jnp.concatenate([
            cols(h2, 1, 3, 1, 1, 0, 1),
            cols(h3, 3, 1, 1, 1, 1, 0),
            cols(h4, 1, 3, 1, 1, 0, 1)], axis=0)           # (9G, L)
        mid = _lrelu(jnp.dot(wm_ref[...], cols_mid,
                             preferred_element_type=jnp.float32) + bm_ref[...])
        m2 = mid[0:G]
        m3 = mid[G:2 * G]
        m4 = mid[2 * G:3 * G]

        # branch4's extra 3x1 conv.
        b43 = _lrelu(jnp.dot(wb_ref[...], cols(m4, 3, 1, 1, 1, 1, 0),
                             preferred_element_type=jnp.float32) + bb_ref[...])

        # branch-final dilated 3x3s + conv_linear (folded) + 0.2*shortcut
        # + outer LeakyReLU, as one fat-K dot.
        cols_tail = jnp.concatenate([
            cols(h1, 3, 3, 1, 1, 1, 1),
            cols(m2, 3, 3, 3, 3, 3, 3),
            cols(m3, 3, 3, 3, 3, 3, 3),
            cols(b43, 3, 3, 5, 5, 5, 5),
            x], axis=0)                                    # (36G + C, L)
        y = _lrelu(jnp.dot(wt_ref[...], cols_tail,
                           preferred_element_type=jnp.float32) + bt_ref[...])
        o_ref[0] = y.astype(o_ref.dtype)

    return kernel


def rfb_pallas(p, x_ncl, H, W, storage_dtype):
    N, C, L = x_ncl.shape
    bc = C // 4
    G = ((bc + 7) // 8) * 8                                # 8-row channel groups
    packed = _pack_rfb_weights(p, C, G)
    w_specs = [pl.BlockSpec(w.shape, lambda n: (0, 0)) for w in packed]
    return pl.pallas_call(
        _make_rfb_kernel(C, G, H, W, _roll_sign()),
        out_shape=jax.ShapeDtypeStruct((N, C, L), storage_dtype),
        grid=(N,),
        in_specs=[pl.BlockSpec((1, C, L), lambda n: (n, 0, 0))] + w_specs,
        out_specs=pl.BlockSpec((1, C, L), lambda n: (n, 0, 0)),
        compiler_params=pltpu.CompilerParams(
            dimension_semantics=("parallel",),
            vmem_limit_bytes=_VMEM_LIMIT_BYTES),
    )(x_ncl.astype(storage_dtype), *packed)


# -----------------------------------------------------------------------------
# XLA layout glue.
# -----------------------------------------------------------------------------
def pixel_shuffle_nchw(x, r):
    N, C4, H, W = x.shape
    C = C4 // (r * r)
    x = x.reshape(N, C, r, r, H, W)
    x = jnp.transpose(x, (0, 1, 4, 2, 5, 3))
    return x.reshape(N, C, H * r, W * r)


def upsample_nearest_nchw(x, r):
    x = jnp.repeat(x, r, axis=2)
    return jnp.repeat(x, r, axis=3)


# -----------------------------------------------------------------------------
# Fused forward pass (3 pallas_calls).
# -----------------------------------------------------------------------------
def subpixel_forward_pallas(params, x, *, storage_dtype):
    N, C, H, W = x.shape
    y = conv3x3_pallas(x.reshape(N, C, H * W), params["conv"], H, W,
                       storage_dtype)                            # Pallas #1
    y = pixel_shuffle_nchw(y.reshape(N, 4 * C, H, W), 2)         # XLA glue
    H2, W2 = 2 * H, 2 * W
    y = rfb_pallas(params["rfb1"], y.reshape(N, C, H2 * W2), H2, W2,
                   storage_dtype)                                # Pallas #2
    y = upsample_nearest_nchw(y.reshape(N, C, H2, W2), 2)        # XLA glue
    H4, W4 = 4 * H, 4 * W
    y = rfb_pallas(params["rfb2"], y.reshape(N, C, H4 * W4), H4, W4,
                   storage_dtype)                                # Pallas #3
    return y.reshape(N, C, H4, W4)


# -----------------------------------------------------------------------------
# Pure-JAX reference (unfused, lax.conv) - validation only.
# -----------------------------------------------------------------------------
def conv2d_ref(x, p, pad, dil, fuse_lrelu):
    y = jax.lax.conv_general_dilated(
        x, p["w"], window_strides=(1, 1),
        padding=((pad[0], pad[0]), (pad[1], pad[1])),
        rhs_dilation=dil,
        dimension_numbers=("NCHW", "HWIO", "NCHW"),
        precision=jax.lax.Precision.HIGHEST)
    y = y + p["b"].reshape(1, -1, 1, 1)
    if fuse_lrelu:
        y = jnp.where(y >= 0.0, y, NEG_SLOPE * y)
    return y


def rfb_ref(p, x, outer_lrelu):
    b1 = conv2d_ref(x, p["b1_1"], (0, 0), (1, 1), True)
    b1 = conv2d_ref(b1, p["b1_2"], (1, 1), (1, 1), False)

    b2 = conv2d_ref(x, p["b2_1"], (0, 0), (1, 1), True)
    b2 = conv2d_ref(b2, p["b2_2"], (0, 1), (1, 1), True)
    b2 = conv2d_ref(b2, p["b2_3"], (3, 3), (3, 3), False)

    b3 = conv2d_ref(x, p["b3_1"], (0, 0), (1, 1), True)
    b3 = conv2d_ref(b3, p["b3_2"], (1, 0), (1, 1), True)
    b3 = conv2d_ref(b3, p["b3_3"], (3, 3), (3, 3), False)

    b4 = conv2d_ref(x, p["b4_1"], (0, 0), (1, 1), True)
    b4 = conv2d_ref(b4, p["b4_2"], (0, 1), (1, 1), True)
    b4 = conv2d_ref(b4, p["b4_3"], (1, 0), (1, 1), True)
    b4 = conv2d_ref(b4, p["b4_4"], (5, 5), (5, 5), False)

    cat = jnp.concatenate([b1, b2, b3, b4], axis=1)
    lin = conv2d_ref(cat, p["conv_linear"], (0, 0), (1, 1), False)
    sc = conv2d_ref(x, p["shortcut"], (0, 0), (1, 1), False)
    y = lin + 0.2 * sc
    if outer_lrelu:
        y = jnp.where(y >= 0.0, y, NEG_SLOPE * y)
    return y


def subpixel_forward_ref(params, x):
    out = conv2d_ref(x, params["conv"], (1, 1), (1, 1), False)
    out = pixel_shuffle_nchw(out, 2)
    out = rfb_ref(params["rfb1"], out, True)
    out = upsample_nearest_nchw(out, 2)
    out = rfb_ref(params["rfb2"], out, True)
    return out


# -----------------------------------------------------------------------------
# Parameters (deterministic, PyTorch-default-like uniform init), HWIO layout.
# -----------------------------------------------------------------------------
def make_conv(key, cin, cout, kh, kw):
    k1, k2 = jax.random.split(key)
    bound = 1.0 / float(cin * kh * kw) ** 0.5
    w = jax.random.uniform(k1, (kh, kw, cin, cout), jnp.float32, -bound, bound)
    b = jax.random.uniform(k2, (cout,), jnp.float32, -bound, bound)
    return {"w": w, "b": b}


def make_rfb(key, cin, cout):
    bc = cin // 4
    ks = jax.random.split(key, 14)
    return {
        "b1_1": make_conv(ks[0], cin, bc, 1, 1),
        "b1_2": make_conv(ks[1], bc, bc, 3, 3),
        "b2_1": make_conv(ks[2], cin, bc, 1, 1),
        "b2_2": make_conv(ks[3], bc, bc, 1, 3),
        "b2_3": make_conv(ks[4], bc, bc, 3, 3),
        "b3_1": make_conv(ks[5], cin, bc, 1, 1),
        "b3_2": make_conv(ks[6], bc, bc, 3, 1),
        "b3_3": make_conv(ks[7], bc, bc, 3, 3),
        "b4_1": make_conv(ks[8], cin, bc // 2, 1, 1),
        "b4_2": make_conv(ks[9], bc // 2, (bc // 4) * 3, 1, 3),
        "b4_3": make_conv(ks[10], (bc // 4) * 3, bc, 3, 1),
        "b4_4": make_conv(ks[11], bc, bc, 3, 3),
        "conv_linear": make_conv(ks[12], 4 * bc, cout, 1, 1),
        "shortcut": make_conv(ks[13], cin, cout, 1, 1),
    }


# -----------------------------------------------------------------------------
if __name__ == "__main__":
    _ = _roll_matches_jnp()          # resolve pltpu.roll convention before jit

    key = jax.random.PRNGKey(0)
    k_x, k_p = jax.random.split(key)

    N, C, H, W = 2, 16, 16, 16                   # channels=16 (module default)
    x = jax.random.normal(k_x, (N, C, H, W), jnp.float32)     # NCHW

    kc, k1, k2 = jax.random.split(k_p, 3)
    params = {
        "conv": make_conv(kc, C, C * 4, 3, 3),
        "rfb1": make_rfb(k1, C, C),
        "rfb2": make_rfb(k2, C, C),
    }

    fwd_bf16 = jax.jit(functools.partial(subpixel_forward_pallas,
                                         storage_dtype=jnp.bfloat16))
    fwd_f32 = jax.jit(functools.partial(subpixel_forward_pallas,
                                        storage_dtype=jnp.float32))
    fwd_ref = jax.jit(subpixel_forward_ref)

    # primary optimized (bf16 storage, f32 in-kernel math) run
    out = jax.block_until_ready(fwd_bf16(params, x))
    assert out.shape == (N, C, 4 * H, 4 * W), out.shape

    # validation against plain lax.conv (relative error)
    ref = jax.block_until_ready(fwd_ref(params, x))
    scale = max(1.0, float(jnp.max(jnp.abs(ref))))

    out_f32 = jax.block_until_ready(fwd_f32(params, x))
    rel_f32 = float(jnp.max(jnp.abs(out_f32 - ref))) / scale
    assert rel_f32 < 5e-3, f"f32 Pallas path vs reference rel err: {rel_f32}"

    rel_bf16 = float(jnp.max(jnp.abs(out.astype(jnp.float32) - ref))) / scale
    assert rel_bf16 < 5e-2, f"bf16 Pallas path vs reference rel err: {rel_bf16}"

    print("KERNEL_OK")
</pallas_src>

<mosaic_0001>
module attributes {stable_mosaic.version = 11 : i64} {
  func.func @k(%arg0: memref<8x128xf32, #tpu.memory_space<vmem>>, %arg1: memref<8x128xf32, #tpu.memory_space<vmem>>) attributes {dimension_semantics = [], scalar_prefetch = 0 : i64, scratch_operands = 0 : i64, tpu.core_type = #tpu.core_type<tc>} {
    %c0 = arith.constant 0 : index
    %c0_0 = arith.constant 0 : index
    %0 = vector.load %arg0[%c0, %c0_0] : memref<8x128xf32, #tpu.memory_space<vmem>>, vector<8x128xf32>
    %c1_i32 = arith.constant 1 : i32
    %1 = tpu.dynamic_rotate %0 by %c1_i32 dim 1 : vector<8x128xf32>, i32 -> vector<8x128xf32>
    %c0_1 = arith.constant 0 : index
    %c0_2 = arith.constant 0 : index
    %2 = vector.load %arg1[%c0_1, %c0_2] : memref<8x128xf32, #tpu.memory_space<vmem>>, vector<8x128xf32>
    tpu.vector_store %arg1[%c0_1, %c0_2], %1 {strides = array<i32>} : memref<8x128xf32, #tpu.memory_space<vmem>>, vector<8x128xf32>,
    return
  }
}

</mosaic_0001>

<bundles_post_ra>
// kernel: tpu_custom_call.1
= control target key start
LH: loop header
LB: loop body
LE: loop exit
PB: predicated region body
PF: predicated region fallthrough
CT: control target
= control target key end

     0   :  { %6 = vsyncpa [#allocation3], 0  ;;  %s118_s0 = inlined_call_operand.hbm [shape: f32[8,128], index: 0, kind: input, shape index: {}]   ;;  %s119_s1 = inlined_call_operand.hbm [shape: f32[8,128], index: 1, kind: output, shape index: {}]  }
   0x1   :  { %7 = vsyncpa [#allocation4], 0  ;;  %s13_s8 = sshll.u32 %s118_s0, 4  ;;  %s99_s9 = smov [#allocation2]   ;;  %s14_s8 = int_to_ptr.hbm [resolvable:$true] %s13_s8 }
   0x2   :  { %s15_s10 = sshll.u32 %s99_s9, 4  ;;  %s16_s10 = int_to_ptr.vmem [resolvable:$true] %s15_s10 }
   0x3   :  { %18 = dma.hbm_to_vmem [thread:$0]  %s14_s8, 128, %s16_s10, [#allocation3]  }
   0x4   :  { %95 = dma.done.wait [#allocation3], 128  }
   0x5   :  { %96 = vsyncadd [#allocation3], 4294967168  ;;  %v23_v0 = vld [vmem:[#allocation2] sm:$0xff]  ;;  %s100_s11 = smov 1   ;;  %s101_s12 = smov [#allocation5]  }
   0x6   :  { %24 = vrot.lane.b32.xlu0 %v23_v0, %s100_s11  ;;  %s32_s13 = sshll.u32 %s101_s12, 4  ;;  %s34_s16 = sshll.u32 %s119_s1, 4  ;;  %s33_s13 = int_to_ptr.vmem [resolvable:$true] %s32_s13  ;;  %s35_s16 = int_to_ptr.hbm [resolvable:$true] %s34_s16 }
  0x78   :  { %v25_v1 = vpop.permute.xlu0 %24 }
  0x79   :  { %26 = vst [vmem:[#allocation5] sm:$0xff] %v25_v1 }
  0x7a   :  { %37 = dma.vmem_to_hbm [thread:$0]  %s33_s13, 128, %s35_s16, [#allocation4]  }
  0x7b   :  { %97 = dma.done.wait [#allocation4], 128  }
  0x7c   :  { %98 = vsyncadd [#allocation4], 4294967168 }
  0x7d   :  { %42 = vsyncpa [#allocation3], 1 }
  0x7e   :  { %43 = vsyncpa [#allocation4], 1 }

</bundles_post_ra>
